<compile_context>
chip_gen: v7x
topology: tpu7x:2x2x1
jax: 0.10.0
libtpu: 0.0.40
codegen_flags: <defaults>
</compile_context>

<pallas_src>
import math
import numpy as np
import jax
import jax.numpy as jnp
from jax.experimental import pallas as pl
from jax.experimental.pallas import tpu as pltpu

# ------------------------- synthetic (small) config -------------------------
HIDDEN    = 128    # BERT hidden (real: 768)
NH        = 4      # attention heads (real: 12)
HD        = HIDDEN // NH
FFN       = 256    # BERT intermediate (real: 3072)
NLAYERS   = 2      # BERT layers (real: 12)
PROJ      = 128    # text_proj output dim (real: 256) — kept lane-dense (=128)
EMB_DIM   = 2 * PROJ      # subj|obj concatenated dim (real: 512)
ENTI_DIM  = PROJ          # entity text-embedding dim (real: 256)
MAX_L     = 16     # max_txt_len (real: 40)
N_CTX     = 4      # n_context_tokens
NUM_BASE  = 8
NUM_NOVEL = 4
N_ENTI    = 10     # entity classes incl. background row 0 (real: 36)
META_HID  = 64     # meta_cls2embd hidden (real: 256)
RELPOS_D  = 12
RELPOS_H  = 64     # relpos2embd hidden (real: 256)
TEMP      = 0.05   # temperature
BSZ       = 4
LN_EPS    = 1e-12
SEQ_BLK   = 16     # sequences per encoder grid step (raise to 32-64 at real sizes on v6e)
VMEM_LIMIT_BYTES = 48 * 1024 * 1024   # explicit scoped-VMEM limit (safe on v5e/v6e/v7x)


# ------------------------------- helpers ------------------------------------
def _layernorm(x, g, b):
    mu = jnp.mean(x, axis=-1, keepdims=True)
    var = jnp.mean((x - mu) ** 2, axis=-1, keepdims=True)
    return (x - mu) * jax.lax.rsqrt(var + LN_EPS) * g + b


def _l2norm(x):
    # == x / max(||x||, eps) via rsqrt (EUP) instead of sqrt+divide (VALU)
    ss = jnp.sum(x * x, axis=-1, keepdims=True)
    return x * jax.lax.rsqrt(jnp.maximum(ss, 1e-24))


def _softmax_lastdim(s):
    # exact divide (not approx reciprocal) for parity with the PyTorch reference
    s = s - jnp.max(s, axis=-1, keepdims=True)
    p = jnp.exp(s)
    return p / jnp.sum(p, axis=-1, keepdims=True)


# --- feature probe: single-buffered constant-weight BlockSpecs (pl.Buffered(1)) ---
_BUFFERED_OK = None


def _buffered_weights_supported():
    global _BUFFERED_OK
    if _BUFFERED_OK is None:
        try:
            def _probe_kernel(w_ref, o_ref):
                o_ref[...] = w_ref[...] * 2.0

            out = pl.pallas_call(
                _probe_kernel,
                grid=(2,),
                in_specs=[pl.BlockSpec((8, 128), lambda i: (0, 0),
                                       pipeline_mode=pl.Buffered(1))],
                out_specs=pl.BlockSpec((8, 128), lambda i: (i, 0)),
                out_shape=jax.ShapeDtypeStruct((16, 128), jnp.float32),
            )(jnp.ones((8, 128), jnp.float32))
            _BUFFERED_OK = bool(jnp.allclose(out, 2.0))
        except Exception:
            _BUFFERED_OK = False
    return _BUFFERED_OK


def _const_spec(shape):
    nd = len(shape)
    idx = lambda *_, nd=nd: (0,) * nd
    if _buffered_weights_supported():
        # constant index_map -> never re-fetched across grid steps; a single buffer halves
        # weight VMEM residency (matters at real BERT-base sizes).
        return pl.BlockSpec(shape, idx, pipeline_mode=pl.Buffered(1))
    return pl.BlockSpec(shape, idx)


# ------------------------------- kernels ------------------------------------
def encoder_kernel(tok_ref, mask_ref, posln_ref, embg_ref, embb_ref,
                   wqkv_ref, bqkv_ref, wo_ref, bo_ref, ln1g_ref, ln1b_ref,
                   w1_ref, c1_ref, w2_ref, c2_ref, ln2g_ref, ln2b_ref,
                   projw_ref, projb_ref, out_ref):
    # Fused BERT text encoder for one block of SEQ_BLK sequences:
    # embeddings LayerNorm -> NLAYERS transformer layers -> [CLS] text_proj -> L2 norm.
    TB = tok_ref.shape[0]
    L = tok_ref.shape[1]
    Lp = mask_ref.shape[1]            # lane-dense (multiple of 128) padded key/score width
    pad = Lp - L

    x = tok_ref[...] + posln_ref[...]                       # (TB, L, H) + (L, H)
    x = _layernorm(x, embg_ref[...], embb_ref[...])
    x2 = x.reshape(TB * L, HIDDEN)                          # flatten -> full-width MXU matmuls

    # Additive attention bias, materialized ONCE in the padded score layout.
    # Batch order is head-major then sequence (z = h*TB + b) to match _split_heads below.
    mask_b = jnp.broadcast_to(mask_ref[...][None, :, None, :],
                              (NH, TB, L, Lp)).reshape(NH * TB, L, Lp)

    key_pad_zeros = jnp.zeros((NH * TB, pad, HD), jnp.bfloat16) if pad else None

    def _split_heads(qkv_b, base, pad_keys):
        # Take columns [base : base + HIDDEN] of (TB*L, 3H) and lay them out as a head-major
        # batch (NH*TB, L(+pad), HD) using only slice / reshape / leading-axis concat.
        parts = [qkv_b[:, base + h * HD: base + (h + 1) * HD].reshape(1, TB * L, HD)
                 for h in range(NH)]
        y = jnp.concatenate(parts, axis=0).reshape(NH * TB, L, HD)
        if pad_keys and pad:
            y = jnp.concatenate([y, key_pad_zeros], axis=1)   # zero-padded keys/values
        return y

    scale = 1.0 / math.sqrt(HD)
    for li in range(NLAYERS):                               # unrolled; weights resident in VMEM
        # packed QKV projection: one (TB*L, H) @ (H, 3H) matmul (bf16 in, f32 acc)
        xb = x2.astype(jnp.bfloat16)
        qkv = jnp.dot(xb, wqkv_ref[li], preferred_element_type=jnp.float32) + bqkv_ref[li]
        qkv_b = qkv.astype(jnp.bfloat16)

        q = _split_heads(qkv_b, 0, False)                   # (NH*TB, L,  HD)
        k = _split_heads(qkv_b, HIDDEN, True)               # (NH*TB, Lp, HD)
        v = _split_heads(qkv_b, 2 * HIDDEN, True)           # (NH*TB, Lp, HD)

        # one batched score matmul + lane-dense softmax + one batched context matmul
        s = jnp.einsum('zld,zmd->zlm', q, k,
                       preferred_element_type=jnp.float32) * scale
        p = _softmax_lastdim(s + mask_b)
        ctx = jnp.einsum('zlm,zmd->zld', p.astype(jnp.bfloat16), v,
                         preferred_element_type=jnp.float32)
        # heads back onto the feature axis (lane concat, once per layer)
        ctx = jnp.concatenate(
            [ctx[h * TB:(h + 1) * TB].reshape(TB * L, HD) for h in range(NH)], axis=-1)

        # output projection folds the head reduction into a single K=H contraction
        attn = jnp.dot(ctx.astype(jnp.bfloat16), wo_ref[li],
                       preferred_element_type=jnp.float32) + bo_ref[li]
        x2 = _layernorm(x2 + attn, ln1g_ref[li], ln1b_ref[li])

        hmid = jnp.dot(x2.astype(jnp.bfloat16), w1_ref[li],
                       preferred_element_type=jnp.float32) + c1_ref[li]
        # TODO(synk): real BERT uses exact (erf) GELU; tanh approximation used here.
        hmid = jax.nn.gelu(hmid, approximate=True).astype(jnp.bfloat16)  # shrink live FFN buf
        ff = jnp.dot(hmid, w2_ref[li], preferred_element_type=jnp.float32) + c2_ref[li]
        x2 = _layernorm(x2 + ff, ln2g_ref[li], ln2b_ref[li])

    cls = x2.reshape(TB, L, HIDDEN)[:, 0, :]                # last_hidden_state[:, 0, :]
    feat = jnp.dot(cls.astype(jnp.bfloat16), projw_ref[...],
                   preferred_element_type=jnp.float32) + projb_ref[...]
    out_ref[...] = _l2norm(feat)


def cond_ctx_kernel(so_ref, mw1_ref, mb1_ref, mw2_ref, mctx_ref, sctx_ref, octx_ref,
                    s_out_ref, o_out_ref):
    # PromptLearner_Conditional conditioning: meta_cls2embd MLP + cross-attention over
    # meta context tokens, then add subj/obj context embeddings.
    so = so_ref[...]                                        # (n_uniq, 2*ENTI_DIM)
    h = jnp.maximum(jnp.dot(so, mw1_ref[...], preferred_element_type=jnp.float32)
                    + mb1_ref[...], 0.0)
    qq = jnp.dot(h, mw2_ref[...], preferred_element_type=jnp.float32)   # (n_uniq, 2*H)
    k = mctx_ref[...]                                       # (N_CTX, H); v == k
    scale = 1.0 / math.sqrt(HIDDEN)

    def cross_attn(q):
        s = jnp.einsum('nd,cd->nc', q, k, preferred_element_type=jnp.float32) * scale
        p = _softmax_lastdim(s)
        return jnp.dot(p, k, preferred_element_type=jnp.float32)        # (n_uniq, H)

    s_attn = cross_attn(qq[:, :HIDDEN])
    o_attn = cross_attn(qq[:, HIDDEN:])
    s_out_ref[...] = sctx_ref[...][None, :, :] + s_attn[:, None, :]
    o_out_ref[...] = octx_ref[...][None, :, :] + o_attn[:, None, :]


def tail_kernel(s_ref, o_ref, rp_ref, rw1_ref, rb1_ref, rw2_ref, cw_ref, mh_ref,
                logits_ref, loss_ref):
    # Fused tail (single grid-less call, per review): relpos2embd MLP + combined embedding,
    # per-sample classifier logits, sigmoid focal loss (mean).
    s = _l2norm(s_ref[...])
    o = _l2norm(o_ref[...])
    so = jnp.concatenate([s, o], axis=-1) * (1.0 / math.sqrt(2.0))
    h = jnp.maximum(jnp.dot(rp_ref[...], rw1_ref[...], preferred_element_type=jnp.float32)
                    + rb1_ref[...], 0.0)
    rel = _l2norm(jnp.dot(h, rw2_ref[...], preferred_element_type=jnp.float32))
    comb = _l2norm(so + rel)                                 # (bsz, EMB_DIM)

    # classifier weights already gathered per sample's unique-(subj,obj) group -> aligned rows
    # TODO(synk): at real sizes (larger n_cls / EMB_DIM) move this reduction onto the MXU via a
    # batched matmul instead of mul + cross-lane sum.
    cw = cw_ref[...]                                         # (bsz, n_cls, EMB_DIM)
    logits = jnp.sum(cw * comb[:, None, :], axis=-1) * (1.0 / TEMP)
    logits_ref[...] = logits

    # torchvision sigmoid_focal_loss(alpha=0.25, gamma=2, reduction='mean')
    t = mh_ref[...]                                          # (bsz, n_cls) multihot target
    p = jax.nn.sigmoid(logits)
    ce = jnp.maximum(logits, 0.0) - logits * t + jnp.log(1.0 + jnp.exp(-jnp.abs(logits)))
    p_t = p * t + (1.0 - p) * (1.0 - t)
    fl = (0.25 * t + 0.75 * (1.0 - t)) * ce * (1.0 - p_t) ** 2
    loss_ref[...] = jnp.zeros_like(loss_ref) + jnp.sum(fl) * (1.0 / float(fl.size))


# ------------------------- text encoder (AlproTextEncoder) ------------------
def text_encoder_apply(token_embds, token_mask, tp):
    N, L, H = token_embds.shape
    Lp = ((L + 127) // 128) * 128                            # lane-dense key/score width
    mask_bias = (1.0 - token_mask.astype(jnp.float32)) * -10000.0       # (N, L)
    if Lp > L:
        mask_bias = jnp.pad(mask_bias, ((0, 0), (0, Lp - L)), constant_values=-10000.0)

    n_pad = (-N) % SEQ_BLK
    if n_pad:
        token_embds = jnp.concatenate(
            [token_embds, jnp.zeros((n_pad, L, H), token_embds.dtype)], axis=0)
        mask_bias = jnp.concatenate(
            [mask_bias, jnp.zeros((n_pad, Lp), mask_bias.dtype)], axis=0)
    Np = N + n_pad

    weight_args = [tp['pos_type'], tp['emb_gamma'], tp['emb_beta'],
                   tp['wqkv'], tp['bqkv'], tp['wo'], tp['bo'], tp['ln1_g'], tp['ln1_b'],
                   tp['w_ff1'], tp['b_ff1'], tp['w_ff2'], tp['b_ff2'], tp['ln2_g'], tp['ln2_b'],
                   tp['proj_w'], tp['proj_b']]
    # TODO(synk): at real sizes (H=768, FFN=3072, 12 layers) weights cannot stay fully resident
    # (esp. v7x 64 MiB VMEM): add a second 'arbitrary' layer grid axis with per-layer weight
    # BlockSpecs and carry x2 in a persistent VMEM scratch (init at layer 0, project at the last).

    feats = pl.pallas_call(
        encoder_kernel,
        grid=(Np // SEQ_BLK,),
        in_specs=[pl.BlockSpec((SEQ_BLK, L, H), lambda b: (b, 0, 0)),
                  pl.BlockSpec((SEQ_BLK, Lp), lambda b: (b, 0))]
                 + [_const_spec(w.shape) for w in weight_args],
        out_specs=pl.BlockSpec((SEQ_BLK, PROJ), lambda b: (b, 0)),
        out_shape=jax.ShapeDtypeStruct((Np, PROJ), jnp.float32),
        compiler_params=pltpu.CompilerParams(
            dimension_semantics=("parallel",),               # >=2 blocks -> v7x megacore shardable
            vmem_limit_bytes=VMEM_LIMIT_BYTES),
    )(token_embds, mask_bias, *weight_args)
    return feats[:N]


# -------------------- PromptLearner_Conditional glue + kernel ---------------
def prompter_forward_conditional(pp, uniq_so_cls_ids, split='base'):
    s_e = pp['enti_txt_embds'][uniq_so_cls_ids[:, 0]]
    o_e = pp['enti_txt_embds'][uniq_so_cls_ids[:, 1]]
    so_pair = jnp.concatenate([s_e, o_e], axis=-1)           # (n_uniq, 2*ENTI_DIM)
    n_uniq = so_pair.shape[0]

    s_ctx, o_ctx = pl.pallas_call(
        cond_ctx_kernel,
        out_shape=(jax.ShapeDtypeStruct((n_uniq, N_CTX, HIDDEN), jnp.float32),
                   jax.ShapeDtypeStruct((n_uniq, N_CTX, HIDDEN), jnp.float32)),
    )(so_pair, pp['meta_w1'], pp['meta_b1'], pp['meta_w2'],
      pp['meta_ctx'], pp['subj_ctx'], pp['obj_ctx'])

    if split == 'base':
        pids = jnp.arange(1, NUM_BASE + 1)
    elif split == 'novel':
        pids = jnp.arange(NUM_BASE + 1, NUM_BASE + NUM_NOVEL + 1)
    else:  # 'all'
        pids = jnp.arange(1, NUM_BASE + NUM_NOVEL + 1)
    n_cls = int(pids.shape[0])

    prefix = pp['prefix_embds'][pids]                        # (n_cls, 1, H)
    suffix = pp['suffix_embds'][pids]                        # (n_cls, L-1-n_ctx, H)
    mask = pp['token_mask'][pids]                            # (n_cls, L)

    prefix = jnp.broadcast_to(prefix[None], (n_uniq, n_cls) + prefix.shape[1:])
    suffix = jnp.broadcast_to(suffix[None], (n_uniq, n_cls) + suffix.shape[1:])
    s_ctx_b = jnp.broadcast_to(s_ctx[:, None], (n_uniq, n_cls, N_CTX, HIDDEN))
    o_ctx_b = jnp.broadcast_to(o_ctx[:, None], (n_uniq, n_cls, N_CTX, HIDDEN))

    subj_tok = jnp.concatenate([prefix, s_ctx_b, suffix], axis=2).reshape(
        n_uniq * n_cls, MAX_L, HIDDEN)
    obj_tok = jnp.concatenate([prefix, o_ctx_b, suffix], axis=2).reshape(
        n_uniq * n_cls, MAX_L, HIDDEN)
    token_mask = jnp.tile(mask, (n_uniq, 1))
    return subj_tok, obj_tok, token_mask


# --------------------------- forward (train_on_gt_only) ---------------------
def forward_on_gt_only(params, batch_data):
    # batch_data ~ (s_embds, o_embds, relpos_feats, triplet_cls_ids);
    # s_roi_feats / o_roi_feats of the original batch are unused on this path.
    s_embds, o_embds, relpos_feats, triplet_cls_ids = batch_data
    bsz = len(triplet_cls_ids)

    # ---- host glue: multihot targets, so_cls_ids, unique_with_idx_nd ----
    multihot = np.zeros((bsz, NUM_BASE), np.float32)
    so_np = np.zeros((bsz, 2), np.int32)
    for i, spo in enumerate(triplet_cls_ids):
        spo = np.asarray(spo)
        multihot[i, spo[:, 1] - 1] = 1.0
        so_np[i] = spo[0, [0, 2]]
    uniq_so_np, inverse = np.unique(so_np, axis=0, return_inverse=True)
    inverse = np.asarray(inverse).reshape(-1).astype(np.int32)   # sample -> unique-pair group

    multihot = jnp.asarray(multihot)
    uniq_so = jnp.asarray(uniq_so_np.astype(np.int32))
    n_uniq = int(uniq_so_np.shape[0])

    # ---- conditional prompter + fused text encoder (subj & obj in one pass) ----
    subj_tok, obj_tok, token_mask = prompter_forward_conditional(
        params['prompter'], uniq_so, 'base')
    n_seq = subj_tok.shape[0]
    all_tok = jnp.concatenate([subj_tok, obj_tok], axis=0)
    all_mask = jnp.concatenate([token_mask, token_mask], axis=0)
    feats = text_encoder_apply(all_tok, all_mask, params['text'])
    subj_w, obj_w = feats[:n_seq], feats[n_seq:]
    cw = jnp.concatenate([subj_w, obj_w], axis=-1) * (1.0 / math.sqrt(2.0))
    cw = cw.reshape(n_uniq, -1, EMB_DIM)                     # (n_uniq, n_cls, EMB_DIM)
    n_cls = cw.shape[1]

    # Rows kept in ORIGINAL batch order: classifier weights gathered per sample by its unique
    # (subj,obj) group, so logits and multihot targets stay aligned (review fix; the PyTorch
    # reference permutes logits by index_all while leaving multihot in batch order, which only
    # coincides when that permutation is the identity).
    cw_rows = cw[jnp.asarray(inverse)]                       # (bsz, n_cls, EMB_DIM)

    pp = params['prompter']
    logits, loss_2d = pl.pallas_call(
        tail_kernel,
        out_shape=(jax.ShapeDtypeStruct((bsz, n_cls), jnp.float32),
                   jax.ShapeDtypeStruct((1, 1), jnp.float32)),
    )(s_embds, o_embds, relpos_feats,
      pp['rp_w1'], pp['rp_b1'], pp['rp_w2'], cw_rows, multihot)

    loss = loss_2d[0, 0]                                     # reduction='mean'
    return loss, {'total': loss}


# ----------------------------- parameter init -------------------------------
def init_params(key):
    ks = jax.random.split(key, 32)
    it = iter(ks)

    def nrm(shape, std=0.02, dtype=jnp.float32):
        return (jax.random.normal(next(it), shape, jnp.float32) * std).astype(dtype)

    bf = jnp.bfloat16
    text = dict(
        pos_type=nrm((MAX_L, HIDDEN)),            # position + token_type embeddings (folded)
        emb_gamma=jnp.ones((1, HIDDEN), jnp.float32),
        emb_beta=jnp.zeros((1, HIDDEN), jnp.float32),
        # stacked per-layer weights; MXU operands stored bf16, biases/LN params f32
        wqkv=nrm((NLAYERS, HIDDEN, 3 * HIDDEN), dtype=bf),
        bqkv=jnp.zeros((NLAYERS, 1, 3 * HIDDEN), jnp.float32),
        wo=nrm((NLAYERS, HIDDEN, HIDDEN), dtype=bf),
        bo=jnp.zeros((NLAYERS, 1, HIDDEN), jnp.float32),
        ln1_g=jnp.ones((NLAYERS, 1, HIDDEN), jnp.float32),
        ln1_b=jnp.zeros((NLAYERS, 1, HIDDEN), jnp.float32),
        w_ff1=nrm((NLAYERS, HIDDEN, FFN), dtype=bf),
        b_ff1=jnp.zeros((NLAYERS, 1, FFN), jnp.float32),
        w_ff2=nrm((NLAYERS, FFN, HIDDEN), dtype=bf),
        b_ff2=jnp.zeros((NLAYERS, 1, HIDDEN), jnp.float32),
        ln2_g=jnp.ones((NLAYERS, 1, HIDDEN), jnp.float32),
        ln2_b=jnp.zeros((NLAYERS, 1, HIDDEN), jnp.float32),
        proj_w=nrm((HIDDEN, PROJ), dtype=bf),
        proj_b=jnp.zeros((1, PROJ), jnp.float32),
    )

    n_total = 1 + NUM_BASE + NUM_NOVEL
    # synthetic tokenizer output: [CLS] + n_ctx placeholders + ~2 name tokens + [SEP]
    valid = 1 + N_CTX + 3
    token_mask = jnp.concatenate(
        [jnp.ones((n_total, valid), jnp.float32),
         jnp.zeros((n_total, MAX_L - valid), jnp.float32)], axis=1)
    prompter = dict(
        enti_txt_embds=nrm((N_ENTI, ENTI_DIM), std=1.0),
        prefix_embds=nrm((n_total, 1, HIDDEN)),
        suffix_embds=nrm((n_total, MAX_L - 1 - N_CTX, HIDDEN)),
        token_mask=token_mask,
        meta_ctx=nrm((N_CTX, HIDDEN)),
        subj_ctx=nrm((N_CTX, HIDDEN)),
        obj_ctx=nrm((N_CTX, HIDDEN)),
        meta_w1=nrm((2 * ENTI_DIM, META_HID)),
        meta_b1=jnp.zeros((1, META_HID), jnp.float32),
        meta_w2=nrm((META_HID, 2 * HIDDEN)),
        rp_w1=nrm((RELPOS_D, RELPOS_H)),
        rp_b1=jnp.zeros((1, RELPOS_H), jnp.float32),
        rp_w2=nrm((RELPOS_H, EMB_DIM)),
    )
    return dict(text=text, prompter=prompter)


# --------------------------------- main --------------------------------------
if __name__ == "__main__":
    key = jax.random.PRNGKey(0)
    kp, kd = jax.random.split(key)
    params = init_params(kp)

    kd1, kd2, kd3 = jax.random.split(kd, 3)
    s_embds = jax.random.normal(kd1, (BSZ, PROJ), jnp.float32)
    o_embds = jax.random.normal(kd2, (BSZ, PROJ), jnp.float32)
    relpos_feats = jax.random.normal(kd3, (BSZ, RELPOS_D), jnp.float32)

    # triplet_cls_ids: variable-length (k_i, 3) [subj_cls, pred_cls, obj_cls] per sample (host glue)
    rng = np.random.RandomState(0)
    triplet_cls_ids = []
    for _ in range(BSZ):
        k_i = rng.randint(1, 4)
        spo = np.stack([rng.randint(1, N_ENTI, size=k_i),
                        rng.randint(1, NUM_BASE + 1, size=k_i),
                        rng.randint(1, N_ENTI, size=k_i)], axis=1).astype(np.int64)
        triplet_cls_ids.append(spo)

    loss, loss_for_show = forward_on_gt_only(
        params, (s_embds, o_embds, relpos_feats, triplet_cls_ids))
    jax.block_until_ready(loss)
    assert jnp.isfinite(loss)
    print("KERNEL_OK")
</pallas_src>

<mosaic_0001>
module attributes {stable_mosaic.version = 11 : i64} {
  func.func @cond_ctx_kernel(%arg0: memref<4x256xf32, #tpu.memory_space<vmem>>, %arg1: memref<256x64xf32, #tpu.memory_space<vmem>>, %arg2: memref<1x64xf32, #tpu.memory_space<vmem>>, %arg3: memref<64x256xf32, #tpu.memory_space<vmem>>, %arg4: memref<4x128xf32, #tpu.memory_space<vmem>>, %arg5: memref<4x128xf32, #tpu.memory_space<vmem>>, %arg6: memref<4x128xf32, #tpu.memory_space<vmem>>, %arg7: memref<4x4x128xf32, #tpu.memory_space<vmem>>, %arg8: memref<4x4x128xf32, #tpu.memory_space<vmem>>) attributes {dimension_semantics = [], scalar_prefetch = 0 : i64, scratch_operands = 0 : i64, tpu.core_type = #tpu.core_type<tc>} {
    %c0 = arith.constant 0 : index
    %c0_0 = arith.constant 0 : index
    %0 = vector.load %arg0[%c0, %c0_0] : memref<4x256xf32, #tpu.memory_space<vmem>>, vector<4x256xf32>
    %c0_1 = arith.constant 0 : index
    %c0_2 = arith.constant 0 : index
    %1 = vector.load %arg1[%c0_1, %c0_2] : memref<256x64xf32, #tpu.memory_space<vmem>>, vector<256x64xf32>
    %cst = arith.constant dense<0.000000e+00> : vector<4x64xf32>
    %2 = tpu.matmul %0, %1, %cst {dimension_numbers = #tpu.dot_dimension_numbers<[1], [0], [0], [1], [0, 0, 1, 1], [], []>} : vector<4x256xf32>, vector<256x64xf32>, vector<4x64xf32> -> vector<4x64xf32>
    %c0_3 = arith.constant 0 : index
    %c0_4 = arith.constant 0 : index
    %3 = vector.load %arg2[%c0_3, %c0_4] : memref<1x64xf32, #tpu.memory_space<vmem>>, vector<1x64xf32>
    %4 = vector.broadcast %3 : vector<1x64xf32> to vector<4x64xf32>
    %5 = arith.addf %2, %4 : vector<4x64xf32>
    %cst_5 = arith.constant 0.000000e+00 : f32
    %6 = vector.broadcast %cst_5 : f32 to vector<4x64xf32>
    %7 = arith.maximumf %5, %6 : vector<4x64xf32>
    %c0_6 = arith.constant 0 : index
    %c0_7 = arith.constant 0 : index
    %8 = vector.load %arg3[%c0_6, %c0_7] : memref<64x256xf32, #tpu.memory_space<vmem>>, vector<64x256xf32>
    %cst_8 = arith.constant dense<0.000000e+00> : vector<4x256xf32>
    %9 = tpu.matmul %7, %8, %cst_8 {dimension_numbers = #tpu.dot_dimension_numbers<[1], [0], [0], [1], [0, 0, 1, 1], [], []>} : vector<4x64xf32>, vector<64x256xf32>, vector<4x256xf32> -> vector<4x256xf32>
    %c0_9 = arith.constant 0 : index
    %c0_10 = arith.constant 0 : index
    %10 = vector.load %arg4[%c0_9, %c0_10] : memref<4x128xf32, #tpu.memory_space<vmem>>, vector<4x128xf32>
    %11 = vector.extract_strided_slice %9 {offsets = [0, 0], sizes = [4, 128], strides = [1, 1]} : vector<4x256xf32> to vector<4x128xf32>
    "tpu.trace_start"() <{level = 10 : i32, message = "nd,cd->nc"}> : () -> ()
    %cst_11 = arith.constant dense<0.000000e+00> : vector<4x4xf32>
    %12 = tpu.matmul %11, %10, %cst_11 {dimension_numbers = #tpu.dot_dimension_numbers<[1], [1], [0], [0], [0, 0, 1, 0], [], []>} : vector<4x128xf32>, vector<4x128xf32>, vector<4x4xf32> -> vector<4x4xf32>
    "tpu.trace_stop"() : () -> ()
    %cst_12 = arith.constant 0.0883883461 : f32
    %13 = vector.broadcast %cst_12 : f32 to vector<4x4xf32>
    %14 = arith.mulf %12, %13 : vector<4x4xf32>
    %cst_13 = arith.constant dense<0xFF800000> : vector<4xf32>
    %15 = vector.multi_reduction <maximumf>, %14, %cst_13 [1] : vector<4x4xf32> to vector<4xf32>
    %16 = vector.shape_cast %15 : vector<4xf32> to vector<4x1xf32>
    %17 = vector.broadcast %16 : vector<4x1xf32> to vector<4x4xf32>
    %18 = arith.subf %14, %17 : vector<4x4xf32>
    %19 = math.exp %18 : vector<4x4xf32>
    %cst_14 = arith.constant dense<0.000000e+00> : vector<4xf32>
    %20 = vector.multi_reduction <add>, %19, %cst_14 [1] : vector<4x4xf32> to vector<4xf32>
    %21 = vector.shape_cast %20 : vector<4xf32> to vector<4x1xf32>
    %22 = vector.broadcast %21 : vector<4x1xf32> to vector<4x4xf32>
    %23 = arith.divf %19, %22 : vector<4x4xf32>
    %cst_15 = arith.constant dense<0.000000e+00> : vector<4x128xf32>
    %24 = tpu.matmul %23, %10, %cst_15 {dimension_numbers = #tpu.dot_dimension_numbers<[1], [0], [0], [1], [0, 0, 1, 1], [], []>} : vector<4x4xf32>, vector<4x128xf32>, vector<4x128xf32> -> vector<4x128xf32>
    %25 = vector.extract_strided_slice %9 {offsets = [0, 128], sizes = [4, 128], strides = [1, 1]} : vector<4x256xf32> to vector<4x128xf32>
    "tpu.trace_start"() <{level = 10 : i32, message = "nd,cd->nc"}> : () -> ()
    %cst_16 = arith.constant dense<0.000000e+00> : vector<4x4xf32>
    %26 = tpu.matmul %25, %10, %cst_16 {dimension_numbers = #tpu.dot_dimension_numbers<[1], [1], [0], [0], [0, 0, 1, 0], [], []>} : vector<4x128xf32>, vector<4x128xf32>, vector<4x4xf32> -> vector<4x4xf32>
    "tpu.trace_stop"() : () -> ()
    %cst_17 = arith.constant 0.0883883461 : f32
    %27 = vector.broadcast %cst_17 : f32 to vector<4x4xf32>
    %28 = arith.mulf %26, %27 : vector<4x4xf32>
    %cst_18 = arith.constant dense<0xFF800000> : vector<4xf32>
    %29 = vector.multi_reduction <maximumf>, %28, %cst_18 [1] : vector<4x4xf32> to vector<4xf32>
    %30 = vector.shape_cast %29 : vector<4xf32> to vector<4x1xf32>
    %31 = vector.broadcast %30 : vector<4x1xf32> to vector<4x4xf32>
    %32 = arith.subf %28, %31 : vector<4x4xf32>
    %33 = math.exp %32 : vector<4x4xf32>
    %cst_19 = arith.constant dense<0.000000e+00> : vector<4xf32>
    %34 = vector.multi_reduction <add>, %33, %cst_19 [1] : vector<4x4xf32> to vector<4xf32>
    %35 = vector.shape_cast %34 : vector<4xf32> to vector<4x1xf32>
    %36 = vector.broadcast %35 : vector<4x1xf32> to vector<4x4xf32>
    %37 = arith.divf %33, %36 : vector<4x4xf32>
    %cst_20 = arith.constant dense<0.000000e+00> : vector<4x128xf32>
    %38 = tpu.matmul %37, %10, %cst_20 {dimension_numbers = #tpu.dot_dimension_numbers<[1], [0], [0], [1], [0, 0, 1, 1], [], []>} : vector<4x4xf32>, vector<4x128xf32>, vector<4x128xf32> -> vector<4x128xf32>
    %c0_21 = arith.constant 0 : index
    %c0_22 = arith.constant 0 : index
    %39 = vector.load %arg5[%c0_21, %c0_22] : memref<4x128xf32, #tpu.memory_space<vmem>>, vector<4x128xf32>
    %40 = vector.shape_cast %39 : vector<4x128xf32> to vector<1x4x128xf32>
    %41 = vector.shape_cast %24 : vector<4x128xf32> to vector<4x1x128xf32>
    %42 = vector.broadcast %40 : vector<1x4x128xf32> to vector<4x4x128xf32>
    %43 = vector.broadcast %41 : vector<4x1x128xf32> to vector<4x4x128xf32>
    %44 = arith.addf %42, %43 : vector<4x4x128xf32>
    %c0_23 = arith.constant 0 : index
    %c0_24 = arith.constant 0 : index
    %c0_25 = arith.constant 0 : index
    %45 = vector.load %arg7[%c0_23, %c0_24, %c0_25] : memref<4x4x128xf32, #tpu.memory_space<vmem>>, vector<4x4x128xf32>
    tpu.vector_store %arg7[%c0_23, %c0_24, %c0_25], %44 {strides = array<i32>} : memref<4x4x128xf32, #tpu.memory_space<vmem>>, vector<4x4x128xf32>,
    %c0_26 = arith.constant 0 : index
    %c0_27 = arith.constant 0 : index
    %46 = vector.load %arg6[%c0_26, %c0_27] : memref<4x128xf32, #tpu.memory_space<vmem>>, vector<4x128xf32>
    %47 = vector.shape_cast %46 : vector<4x128xf32> to vector<1x4x128xf32>
    %48 = vector.shape_cast %38 : vector<4x128xf32> to vector<4x1x128xf32>
    %49 = vector.broadcast %47 : vector<1x4x128xf32> to vector<4x4x128xf32>
    %50 = vector.broadcast %48 : vector<4x1x128xf32> to vector<4x4x128xf32>
    %51 = arith.addf %49, %50 : vector<4x4x128xf32>
    %c0_28 = arith.constant 0 : index
    %c0_29 = arith.constant 0 : index
    %c0_30 = arith.constant 0 : index
    %52 = vector.load %arg8[%c0_28, %c0_29, %c0_30] : memref<4x4x128xf32, #tpu.memory_space<vmem>>, vector<4x4x128xf32>
    tpu.vector_store %arg8[%c0_28, %c0_29, %c0_30], %51 {strides = array<i32>} : memref<4x4x128xf32, #tpu.memory_space<vmem>>, vector<4x4x128xf32>,
    return
  }
}

</mosaic_0001>

<bundles_post_ra>
// kernel: tpu_custom_call.1
= control target key start
LH: loop header
LB: loop body
LE: loop exit
PB: predicated region body
PF: predicated region fallthrough
CT: control target
= control target key end

     0   :  { %14 = vsyncpa [#allocation3], 0  ;;  %s1142_s0 = inlined_call_operand.vmem [shape: f32[4,256], index: 0, kind: input, shape index: {}]   ;;  %s1143_s1 = inlined_call_operand.vmem [shape: f32[256,64], index: 1, kind: input, shape index: {}]   ;;  %s1144_s2 = inlined_call_operand.vmem [shape: f32[1,64], index: 2, kind: input, shape index: {}]   ;;  %s1145_s3 = inlined_call_operand.vmem [shape: f32[64,256], index: 3, kind: input, shape index: {}]   ;;  %s1146_s4 = inlined_call_operand.vmem [shape: f32[4,128], index: 4, kind: input, shape index: {}]   ;;  %s1147_s5 = inlined_call_operand.vmem [shape: f32[4,128], index: 5, kind: input, shape index: {}]   ;;  %s1148_s6 = inlined_call_operand.vmem [shape: f32[4,128], index: 6, kind: input, shape index: {}]   ;;  %s1149_s7 = inlined_call_operand.hbm [shape: f32[4,4,128], index: 7, kind: output, shape index: {0}]   ;;  %s1150_s8 = inlined_call_operand.hbm [shape: f32[4,4,128], index: 8, kind: output, shape index: {1}]  }
   0x1   :  { %v47_v0 = vld [vmem:[%s1143_s1 + $0x80] sm:$0xff]  ;;  %v48_v1 = vld [vmem:[%s1143_s1 + $0x88] sm:$0xff]  ;;  %v49_v5 = vld [vmem:[%s1143_s1 + $0x90] sm:$0xff] }
   0x2   :  { %v31_v2 = vld [vmem:[%s1143_s1] sm:$0xff]  ;;  %v761_v3 = vpack.c.bf16 %v48_v1, %v47_v0  ;;  %v32_v4 = vld [vmem:[%s1143_s1 + $0x8] sm:$0xff]  ;;  %v50_v6 = vld [vmem:[%s1143_s1 + $0x98] sm:$0xff] }
   0x3   :  { %v763_v7 = vpack.c.bf16 %v32_v4, %v31_v2  ;;  %v765_v8 = vpack.c.bf16 %v50_v6, %v49_v5  ;;  %v33_v9 = vld [vmem:[%s1143_s1 + $0x10] sm:$0xff]  ;;  %v34_v10 = vld [vmem:[%s1143_s1 + $0x18] sm:$0xff]  ;;  %v51_v11 = vld [vmem:[%s1143_s1 + $0xa0] sm:$0xff] }
   0x4   :  { %762 = vmatprep.subr.bf16.mxu0 %v761_v3  ;;  %v52_v12 = vld [vmem:[%s1143_s1 + $0xa8] sm:$0xff]  ;;  %v767_v13 = vpack.c.bf16 %v34_v10, %v33_v9  ;;  %v35_v15 = vld [vmem:[%s1143_s1 + $0x20] sm:$0xff]  ;;  %v53_v17 = vld [vmem:[%s1143_s1 + $0xb0] sm:$0xff] }
   0x5   :  { %764 = vmatpush3.bf16.msra.mxu0 %v763_v7  ;;  %v769_v14 = vpack.c.bf16 %v52_v12, %v51_v11  ;;  %v36_v16 = vld [vmem:[%s1143_s1 + $0x28] sm:$0xff]  ;;  %v54_v18 = vld [vmem:[%s1143_s1 + $0xb8] sm:$0xff]  ;;  %v37_v21 = vld [vmem:[%s1143_s1 + $0x30] sm:$0xff] }
   0x6   :  { %766 = vmatprep.subr.bf16.mxu0 %v765_v8  ;;  %v771_v19 = vpack.c.bf16 %v36_v16, %v35_v15  ;;  %v773_v20 = vpack.c.bf16 %v54_v18, %v53_v17  ;;  %v38_v22 = vld [vmem:[%s1143_s1 + $0x38] sm:$0xff]  ;;  %v55_v23 = vld [vmem:[%s1143_s1 + $0xc0] sm:$0xff]  ;;  %v56_v24 = vld [vmem:[%s1143_s1 + $0xc8] sm:$0xff] }
   0x7   :  { %v30_v25 = vld [vmem:[%s1142_s0] sm:$0xff]  ;;  %v40_v27 = vld [vmem:[%s1143_s1 + $0x48] sm:$0xff]  ;;  %v147_v30 = vld [vmem:[%s1145_s3 + $0x18] sm:$0xff]  ;;  %v775_v32 = vpack.c.bf16 %v38_v22, %v37_v21  ;;  %v777_v37 = vpack.c.bf16 %v56_v24, %v55_v23 }
   0x8   :  { %v39_v26 = vld [vmem:[%s1143_s1 + $0x40] sm:$0xff]  ;;  %v71_v28 = vcombine.high %v30_v25, %v30_v25  ;;  %v145_v29 = vld [vmem:[%s1145_s3 + $0x8] sm:$0xff]  ;;  %v146_v34 = vld [vmem:[%s1145_s3 + $0x10] sm:$0xff] }
   0x9   :  { %768 = vmatpush3.bf16.msra.mxu0 %v767_v13  ;;  %v144_v31 = vld [vmem:[%s1145_s3] sm:$0xff]  ;;  %v793_v33 = vpack.c.bf16 %v147_v30, %v145_v29  ;;  %v149_v35 = vld [vmem:[%s1145_s3 + $0x28] sm:$0xff]  ;;  %v151_v36 = vld [vmem:[%s1145_s3 + $0x38] sm:$0xff] }
   0xa   :  { %770 = vmatprep.subr.bf16.mxu0 %v769_v14  ;;  %137 = vmatprep.mubr.f32.mxu0 %v71_v28  ;;  %v795_v38 = vpack.c.bf16 %v146_v34, %v144_v31  ;;  %v797_v39 = vpack.c.bf16 %v151_v36, %v149_v35  ;;  %v148_v40 = vld [vmem:[%s1145_s3 + $0x20] sm:$0xff]  ;;  %v150_v41 = vld [vmem:[%s1145_s3 + $0x30] sm:$0xff] }
   0xd   :  { %772 = vmatpush3.bf16.msra.mxu0 %v771_v19 }
   0xe   :  { %774 = vmatprep.subr.bf16.mxu0 %v773_v20 }
   0xf   :  { %15 = vsyncpa [#allocation5], 0  ;;  %v57_v42 = vld [vmem:[%s1143_s1 + $0xd0] sm:$0xff]  ;;  %v58_v43 = vld [vmem:[%s1143_s1 + $0xd8] sm:$0xff]  ;;  %794 = vmatprep.subr.bf16.mxu1 %v793_v33  ;;  %v799_v44 = vpack.c.bf16 %v150_v41, %v148_v40  ;;  %v779_v45 = vpack.c.bf16 %v40_v27, %v39_v26  ;;  %v873_v10 = vmov 0.0   ;;  %vm160_vm0 = vcmask 523264  }
  0x10   :  { %796 = vmatpush1.bf16.msra.mxu1 %v795_v38  ;;  %v781_v46 = vpack.c.bf16 %v58_v43, %v57_v42  ;;  %v41_v47 = vld [vmem:[%s1143_s1 + $0x50] sm:$0xff]  ;;  %v42_v48 = vld [vmem:[%s1143_s1 + $0x58] sm:$0xff]  ;;  %v59_v49 = vld [vmem:[%s1143_s1 + $0xe0] sm:$0xff]  ;;  %228 = vmatprep.mubr.f32.mxu1 %v873_v10  ;;  %vm874_vm1 = vmmov 0   ;;  %vm307_vm2 = vcmask 27648   ;;  %vm323_vm3 = vcmask 1043456  }
  0x11   :  { %776 = vmatpush3.bf16.msra.mxu0 %v775_v32  ;;  %798 = vmatprep.subr.bf16.mxu1 %v797_v39  ;;  %v60_v50 = vld [vmem:[%s1143_s1 + $0xe8] sm:$0xff]  ;;  %v783_v51 = vpack.c.bf16 %v42_v48, %v41_v47  ;;  %v43_v53 = vld [vmem:[%s1143_s1 + $0x60] sm:$0xff]  ;;  %v61_v55 = vld [vmem:[%s1143_s1 + $0xf0] sm:$0xff]  ;;  %vm319_vm4 = vcmask 31744   ;;  %v875_v32 = vmov 1966171168   ;;  %v557_v34 = vlaneseq }
  0x12   :  { %778 = vmatprep.subr.bf16.mxu0 %v777_v37  ;;  %v785_v52 = vpack.c.bf16 %v60_v50, %v59_v49  ;;  %v44_v54 = vld [vmem:[%s1143_s1 + $0x68] sm:$0xff]  ;;  %v62_v56 = vld [vmem:[%s1143_s1 + $0xf8] sm:$0xff]  ;;  %v45_v59 = vld [vmem:[%s1143_s1 + $0x70] sm:$0xff]  ;;  %v555_v33 = vunpack.c.l.s4 %v875_v32 }
  0x13   :  { %v787_v57 = vpack.c.bf16 %v44_v54, %v43_v53  ;;  %v789_v58 = vpack.c.bf16 %v62_v56, %v61_v55  ;;  %v46_v60 = vld [vmem:[%s1143_s1 + $0x78] sm:$0xff]  ;;  %v153_v62 = vld [vmem:[%s1145_s3 + $0x48] sm:$0xff]  ;;  %v152_v1 = vld [vmem:[%s1145_s3 + $0x40] sm:$0xff]  ;;  %v558_v36 = vshrl.u32 %v557_v34, 7 }
  0x14   :  { %800 = vmatpush1.bf16.msra.mxu1 %v799_v44  ;;  %v791_v61 = vpack.c.bf16 %v46_v60, %v45_v59  ;;  %v155_v63 = vld [vmem:[%s1145_s3 + $0x58] sm:$0xff]  ;;  %v154_v2 = vld [vmem:[%s1145_s3 + $0x50] sm:$0xff]  ;;  %v157_v4 = vld [vmem:[%s1145_s3 + $0x68] sm:$0xff]  ;;  %v556_v35 = vunpack.c.0.s8 %v555_v33 }
  0x15   :  { %780 = vmatpush3.bf16.msra.mxu0 %v779_v45  ;;  %v801_v0 = vpack.c.bf16 %v155_v63, %v153_v62  ;;  %v803_v3 = vpack.c.bf16 %v154_v2, %v152_v1  ;;  %v159_v5 = vld [vmem:[%s1145_s3 + $0x78] sm:$0xff]  ;;  %v156_v7 = vld [vmem:[%s1145_s3 + $0x60] sm:$0xff]  ;;  %v158_v8 = vld [vmem:[%s1145_s3 + $0x70] sm:$0xff]  ;;  %v1088_v40 = vsub.s32 0, %v558_v36 }
  0x16   :  { %782 = vmatprep.subr.bf16.mxu0 %v781_v46  ;;  %v805_v6 = vpack.c.bf16 %v159_v5, %v157_v4  ;;  %v807_v9 = vpack.c.bf16 %v158_v8, %v156_v7  ;;  %v692_v12 = vld [vmem:[%s1144_s2] ss:$0 sm:$0xff]  ;;  %v1085_v37 = vsub.s32 %v556_v35, %v558_v36 }
  0x17   :  { %802 = vmatprep.subr.bf16.mxu1 %v801_v0  ;;  %v235_v17 = vld [vmem:[%s1146_s4] sm:$0xf]  ;;  %s876_s4 = smov [#allocation2]  }
  0x18   :  { %804 = vmatpush1.bf16.msra.mxu1 %v803_v3  ;;  %v552_v44 = vld [vmem:[%s1147_s5] sm:$0xf]  ;;  %s665_s5 = sshll.u32 %s876_s4, 4  ;;  %s666_s5 = int_to_ptr.vmem [resolvable:$true] %s665_s5 }
  0x19   :  { %784 = vmatpush3.bf16.msra.mxu0 %v783_v51  ;;  %806 = vmatprep.subr.bf16.mxu1 %v805_v6  ;;  %s825_s15 = scalar_lea.vmem %s666_s5, 256  ;;  %p830_p1 = scmp.lt.s32.totalorder %s666_s5, %s666_s5 }
  0x1a   :  { %786 = vmatprep.subr.bf16.mxu0 %v785_v52  ;;  %p826_p0 = scmp.ne.s32.totalorder %s666_s5, %s825_s15  ;;  %p831_p2 = scmp.lt.s32.totalorder %s825_s15, %s825_s15 }
  0x1c   :  { %808 = vmatpush1.bf16.msra.mxu1 %v807_v9  ;;  %p832_p3 = por %p831_p2, %p830_p1 }
  0x1d   :  { %788 = vmatpush3.bf16.msra.mxu0 %v787_v57  ;;  %741 = vmatprep.subr.mxu1 %v873_v10 }
  0x1e   :  { %790 = vmatprep.subr.bf16.mxu0 %v789_v58  ;;  %p833_p4 = pnand %p832_p3, %p826_p0 }
  0x21   :  { %792 = vmatpush3.bf16.msra.mxu0 %v791_v61 }
  0x24   :  { %138 = vmatmul.mubr.f32.vlgmr.msra.gmra.mrb[0].mxu0 %v30_v25 }
  0xf7   :  { %v730_v11 = vpop.f32.mrb[0].mxu0 }
  0xf8   :  { %v731_v13 = vpop.f32.mrb[1].mxu0 }
  0xf9   :  { %v732_v14 = vadd.f32 %v731_v13, %v730_v11 }
  0xfb   :  { %v140_v15 = vadd.f32 %v732_v14, %v692_v12 }
  0xfd   :  { %v143_v16 = vmax.f32 %v140_v15, 0.0 }
  0xff   :  { %693 = vmatmul.mubr.msk.f32.vlgmr.msra.gmra.mrb[0].mxu1 %vm160_vm0, %v143_v16 }
 0x100   :  { %742 = vmatpush3.xpose.msra.mxu1 %v235_v17  ;;  %743 = vmatprep.mubr.msk.f32.mxu1 %vm874_vm1, %v873_v10 }
 0x101   :  { %746 = vmatprep.subr.mxu1 %v873_v10 }
 0x1d2   :  { %v230_v18 = vpop.f32.mrb[0].mxu1 }
 0x1d3   :  { %v232_v19 = vpop.f32.mrb[1].mxu1  ;;  %744 = vmatmul.mubr.f32.vlgmr.msra.gmra.mrb[2].mxu1 %v230_v18 }
 0x1d4   :  { %748 = vmatprep.mubr.msk.f32.mxu1 %vm874_vm1, %v873_v10  ;;  %747 = vmatpush3.msk.msra.mxu1 %vm323_vm3, %v235_v17 }
 0x1d5   :  { %751 = vmatprep.subr.mxu1 %v873_v10 }
 0x2a6   :  { %v302_v20 = vpop.f32.mrb[2].mxu1 }
 0x2a7   :  { %v306_v21 = vmul.f32 0.088388346, %v302_v20  ;;  %v745_v22 = vpop.f32.mrb[3].mxu1 }
 0x2a9   :  { %v308_v23 = vsel %vm307_vm2, %v306_v21, -inf }
 0x2aa   :  { %309 = vmax.xlane.f32.xlu0 %v308_v23 }
 0x337   :  { %v310_v24 = vpop.xlane.xlu0 %309 }
 0x338   :  { %v311_v25 = vsub.f32 %v306_v21, %v310_v24 }
 0x33a   :  { %v312_v26 = vmul.f32 1.442695, %v311_v25 }
 0x33c   :  { %817 = vpow2.f32 %v312_v26 }
 0x346   :  { %v818_v27 = vpop.eup %817 }
 0x347   :  { %v314_v28 = vsel %vm307_vm2, %v818_v27, 0.0 }
 0x348   :  { %315 = vadd.xlane.f32.xlu0 %v314_v28 }
 0x3d5   :  { %v316_v29 = vpop.xlane.xlu0 %315 }
 0x3d6   :  { %819 = vrcp.f32 %v316_v29 }
 0x3e0   :  { %v820_v30 = vpop.eup %819 }
 0x3e1   :  { %v318_v31 = vmul.f32 %v820_v30, %v818_v27 }
 0x3e3   :  { %749 = vmatmul.mubr.msk.f32.vlgmr.msra.gmra.mrb[4].mxu1 %vm319_vm4, %v318_v31 }
 0x3e4   :  { %752 = vmatpush3.xpose.msra.mxu1 %v235_v17  ;;  %753 = vmatprep.mubr.msk.f32.mxu1 %vm874_vm1, %v873_v10 }
 0x3e5   :  { %756 = vmatprep.subr.mxu1 %v873_v10 }
 0x3e7   :  { %754 = vmatmul.mubr.f32.vlgmr.msra.gmra.mrb[6].mxu1 %v232_v19 }
 0x3e8   :  { %757 = vmatpush3.msk.msra.mxu1 %vm323_vm3, %v235_v17  ;;  %758 = vmatprep.mubr.msk.f32.mxu1 %vm874_vm1, %v873_v10 }
 0x4b6   :  { %v393_v38 = vpop.f32.mrb[4].mxu1 }
 0x4b7   :  { %v560_v39 = vrot.slane %v393_v38, %v1085_v37  ;;  %v750_v41 = vpop.f32.mrb[5].mxu1 }
 0x4b9   :  { %v561_v42 = vcombine.high %v560_v39, %v560_v39  ;;  %v568_v43 = vrot.slane %v560_v39, %v1085_v37 }
 0x4ba   :  { %v463_v45 = vpop.f32.mrb[6].mxu1 }
 0x4bb   :  { %v575_v46 = vrot.slane %v561_v42, %v1085_v37  ;;  %v576_v47 = vcombine.high %v568_v43, %v568_v43  ;;  %v581_v48 = vrot.slane %v568_v43, %v1088_v40  ;;  %v467_v49 = vmul.f32 0.088388346, %v463_v45  ;;  %v755_v50 = vpop.f32.mrb[7].mxu1 }
 0x4bd   :  { %v577_v51 = vcombine.high %v575_v46, %v575_v46  ;;  %v585_v52 = vrot.slane %v575_v46, %v1088_v40  ;;  %v589_v53 = vrot.slane %v576_v47, %v1088_v40  ;;  %v598_v54 = vadd.f32 %v581_v48, %v552_v44 }
 0x4be   :  { %v468_v55 = vsel %vm307_vm2, %v467_v49, -inf }
 0x4bf   :  { %v593_v56 = vrot.slane %v577_v51, %v1088_v40  ;;  %v599_v57 = vadd.f32 %v585_v52, %v552_v44  ;;  %v600_v58 = vadd.f32 %v589_v53, %v552_v44  ;;  %602 = vst [vmem:[#allocation2] sm:$0xf] %v598_v54  ;;  %469 = vmax.xlane.f32.xlu1 %v468_v55 }
 0x4c1   :  { %v601_v59 = vadd.f32 %v593_v56, %v552_v44  ;;  %603 = vst [vmem:[#allocation2 + $0x4] sm:$0xf] %v599_v57  ;;  %604 = vst [vmem:[#allocation2 + $0x8] sm:$0xf] %v600_v58 }
 0x4c3   :  { %605 = vst [vmem:[#allocation2 + $0xc] sm:$0xf] %v601_v59 }
 0x54c   :  { %v470_v60 = vpop.xlane.xlu1 %469 }
 0x54d   :  { %v471_v61 = vsub.f32 %v467_v49, %v470_v60 }
 0x54f   :  { %v472_v62 = vmul.f32 1.442695, %v471_v61 }
 0x551   :  { %821 = vpow2.f32 %v472_v62 }
 0x55b   :  { %v822_v63 = vpop.eup %821 }
 0x55c   :  { %v474_v0 = vsel %vm307_vm2, %v822_v63, 0.0 }
 0x55d   :  { %475 = vadd.xlane.f32.xlu1 %v474_v0 }
 0x5ea   :  { %v476_v1 = vpop.xlane.xlu1 %475 }
 0x5eb   :  { %823 = vrcp.f32 %v476_v1 }
 0x5f5   :  { %v824_v2 = vpop.eup %823 }
 0x5f6   :  { %v478_v3 = vmul.f32 %v824_v2, %v822_v63 }
 0x5f8   :  { %759 = vmatmul.mubr.msk.f32.vlgmr.msra.gmra.mrb[8].mxu1 %vm319_vm4, %v478_v3 }
 0x5f9   :  { %836 = shalt.err (!%p833_p4)
}
 0x5fa   :  { %s837_s18 = scalar_lea.hbm %s1149_s7, 256 }
 0x5fb   :  { %p838_p5 = scmp.ne.s32.totalorder %s1149_s7, %s837_s18  ;;  %p841_p6 = scmp.lt.u32.totalorder %s837_s18, %s1149_s7 }
 0x5fd   :  { %p843_p7 = pnand %p841_p6, %p838_p5 }
 0x5ff   :  { %846 = shalt.err (!%p843_p7)
}
 0x600   :  { %s877_s23 = smov 64   ;;  %s878_s24 = smov 4   ;;  %v606_v9 = vld [vmem:[%s1148_s6] sm:$0xf] }
 0x601   :  { %671 = dma.vmem_to_hbm [thread:$0]  %s666_s5, 256, %s1149_s7, [#allocation3], %s877_s23, %s877_s23, %s878_s24  }
 0x602   :  { %s879_s7 = smov [#allocation4]  }
 0x603   :  { %s677_s28 = sshll.u32 %s879_s7, 4  ;;  %s678_s28 = int_to_ptr.vmem [resolvable:$true] %s677_s28 }
 0x604   :  { %s847_s6 = scalar_lea.vmem %s678_s28, 256  ;;  %p852_p9 = scmp.lt.s32.totalorder %s678_s28, %s678_s28 }
 0x605   :  { %p848_p8 = scmp.ne.s32.totalorder %s678_s28, %s847_s6  ;;  %p853_p10 = scmp.lt.s32.totalorder %s847_s6, %s847_s6 }
 0x607   :  { %p854_p11 = por %p853_p10, %p852_p9 }
 0x609   :  { %p855_p12 = pnand %p854_p11, %p848_p8 }
 0x6cb   :  { %v548_v4 = vpop.f32.mrb[8].mxu1 }
 0x6cc   :  { %v614_v5 = vrot.slane %v548_v4, %v1085_v37  ;;  %v760_v6 = vpop.f32.mrb[9].mxu1 }
 0x6ce   :  { %v615_v7 = vcombine.high %v614_v5, %v614_v5  ;;  %v622_v8 = vrot.slane %v614_v5, %v1085_v37 }
 0x6d0   :  { %v629_v10 = vrot.slane %v615_v7, %v1085_v37  ;;  %v630_v11 = vcombine.high %v622_v8, %v622_v8  ;;  %v635_v12 = vrot.slane %v622_v8, %v1088_v40 }
 0x6d2   :  { %v631_v13 = vcombine.high %v629_v10, %v629_v10  ;;  %v639_v14 = vrot.slane %v629_v10, %v1088_v40  ;;  %v643_v15 = vrot.slane %v630_v11, %v1088_v40  ;;  %v652_v16 = vadd.f32 %v635_v12, %v606_v9 }
 0x6d4   :  { %v647_v17 = vrot.slane %v631_v13, %v1088_v40  ;;  %v653_v18 = vadd.f32 %v639_v14, %v606_v9  ;;  %v654_v19 = vadd.f32 %v643_v15, %v606_v9  ;;  %656 = vst [vmem:[#allocation4] sm:$0xf] %v652_v16 }
 0x6d6   :  { %v655_v20 = vadd.f32 %v647_v17, %v606_v9  ;;  %657 = vst [vmem:[#allocation4 + $0x4] sm:$0xf] %v653_v18  ;;  %658 = vst [vmem:[#allocation4 + $0x8] sm:$0xf] %v654_v19 }
 0x6d8   :  { %659 = vst [vmem:[#allocation4 + $0xc] sm:$0xf] %v655_v20 }
 0x6d9   :  { %858 = shalt.err (!%p855_p12)
}
 0x6da   :  { %s859_s0 = scalar_lea.hbm %s1150_s8, 256 }
 0x6db   :  { %p860_p13 = scmp.ne.s32.totalorder %s1150_s8, %s859_s0  ;;  %p863_p0 = scmp.lt.u32.totalorder %s859_s0, %s1150_s8 }
 0x6dd   :  { %p865_p1 = pnand %p863_p0, %p860_p13 }
 0x6df   :  { %868 = shalt.err (!%p865_p1)
}
 0x6e0   :  { %683 = dma.vmem_to_hbm [thread:$0]  %s678_s28, 256, %s1150_s8, [#allocation5], %s877_s23, %s877_s23, %s878_s24  }
 0x6e1   :  { %869 = dma.done.wait [#allocation3], 256  }
 0x6e2   :  { %870 = vsyncadd [#allocation3], 4294967040 }
 0x6e3   :  { %871 = dma.done.wait [#allocation5], 256  }
 0x6e4   :  { %872 = vsyncadd [#allocation5], 4294967040 }
 0x6e5   :  { %690 = vsyncpa [#allocation3], 1 }
 0x6e6   :  { %691 = vsyncpa [#allocation5], 1 }

</bundles_post_ra>
